<compile_context>
chip_gen: v5e
topology: v5e:2x2
jax: 0.10.0
libtpu: 0.0.40
codegen_flags: <defaults>
</compile_context>

<pallas_src>
import numpy as np

import jax
import jax.numpy as jnp
from jax.experimental import pallas as pl
from jax.experimental.pallas import tpu as pltpu


def _round_up(a: int, b: int) -> int:
    return ((a + b - 1) // b) * b


def _bilinear_matrix(out_size: int, in_size: int) -> np.ndarray:
    """(out_size, in_size) interpolation matrix, bilinear, align_corners=True."""
    if out_size == 1:
        src = np.zeros((1,), np.float64)
    else:
        src = np.arange(out_size, dtype=np.float64) * (
            (in_size - 1) / (out_size - 1))
    i0 = np.clip(np.floor(src), 0, in_size - 1).astype(np.int64)
    i1 = np.minimum(i0 + 1, in_size - 1)
    frac = (src - i0).astype(np.float32)
    m = np.zeros((out_size, in_size), np.float32)
    rows = np.arange(out_size)
    m[rows, i0] += (1.0 - frac)
    m[rows, i1] += frac
    return m


def _vmem_budget():
    """Generation-aware (per-TensorCore) VMEM budget + scoped-VMEM limit."""
    cap = None
    try:
        info = pltpu.get_tpu_info()
        cap = getattr(info, "vmem_capacity_bytes", None)
    except Exception:
        cap = None
    if not cap:
        cap = 64 * 2**20          # conservative fallback (v7x-sized)
    working = int(cap * 0.45)     # ~57 MiB on 128 MiB VMEM, ~28 MiB on 64 MiB
    limit = int(cap * 0.75)       # ~96 MiB on 128 MiB VMEM, ~48 MiB on 64 MiB
    return working, limit


def _pick_tc(nc, per_row_in_bytes, out_row_bytes, rt_bytes, budget_bytes):
    """Channel-tile size TC (multiple of 8) against the VMEM budget.

    per_row_in_bytes : bytes of all input features for one channel row
    out_row_bytes    : bytes of one output row
    rt_bytes         : total bytes of the (single-buffered) resize matrices
    """
    nc8 = _round_up(nc, 8)
    # Double-buffered inputs and output (no accumulator scratch anymore).
    per_chan = 2 * per_row_in_bytes + 2 * out_row_bytes
    avail = max(budget_bytes - rt_bytes, per_chan)
    tc_max = max(8, int(avail // per_chan) // 8 * 8)
    if nc8 <= tc_max:
        # Whole channel axis fits one block.  Split in two (even, multiple of
        # 8) so a 2-TensorCore chip (v7x) can run both halves in parallel;
        # the extra grid step costs ~0.35us, negligible on 1-TC chips.
        if nc8 >= 16 and nc8 % 16 == 0:
            return nc8 // 2
        return nc8
    # Tile within the budget: prefer a divisor of the 8-padded channel count
    # (no row padding needed), otherwise take the largest budget-fitting tile
    # and let the wrapper zero-pad the channel axis up to a multiple of it.
    cands = [d for d in range(8, tc_max + 1, 8) if nc8 % d == 0]
    return max(cands) if cands else tc_max


def _make_fusion_kernel(n_features, needs_resize):
    def kernel(w_ref, *refs):
        # refs = [x_0, (rT_0)?, x_1, (rT_1)?, ..., out_ref]
        out_ref = refs[-1]
        acc = None
        idx = 0
        for k in range(n_features):
            x = refs[idx][...]                      # native dtype (MXU path)
            idx += 1
            if needs_resize[k]:
                rT = refs[idx][...]                 # (Sk, S_pad), weight folded
                idx += 1
                contrib = jnp.dot(x, rT,
                                  preferred_element_type=jnp.float32)
            else:
                # Same-size feature: VPU only; widen for v5e's f32-only VPU.
                contrib = w_ref[k] * x.astype(jnp.float32)
            acc = contrib if acc is None else acc + contrib
        # Single summed expression, single lane-dense store (no scratch
        # round trip; on v7x the matmul results can accumulate in the MRB).
        out_ref[...] = acc.astype(out_ref.dtype)

    return kernel


def feature_fusion(inputs, weight, method: str = "softmax"):
    """Pallas implementation of FeatureFusion.forward.

    inputs : list of NCHW arrays with identical N, C (spatial dims may differ)
    weight : (n_features,) parameter (used for softmax / fast-normalize)
    """
    n_features = len(inputs)
    assert n_features >= 2
    N, C, H, W = inputs[0].shape
    NC = N * C
    S = H * W
    S_pad = _round_up(S, 128)                      # lane-dense output stores
    out_dtype = inputs[0].dtype

    if method == "softmax":
        ws = jax.nn.softmax(weight.astype(jnp.float32), axis=0)
    elif method == "fast-normalize":
        ws = jax.nn.relu(weight.astype(jnp.float32))
        ws = ws / (jnp.sum(ws) + 0.0001)
    elif method == "sum":
        ws = jnp.ones((n_features,), jnp.float32)
    else:
        # TODO(synk): maxout-cat variant
        raise NotImplementedError("maxout-cat not implemented")

    xs2d, rmats, needs_resize, cols = [], [], [], []
    for k, x in enumerate(inputs):
        n_, c_, Hk, Wk = x.shape
        assert (n_, c_) == (N, C)
        sk = Hk * Wk
        x2 = x.reshape(NC, sk)                      # free, row-major
        if (Hk, Wk) == (H, W):
            needs_resize.append(False)
            rmats.append(None)
            if S_pad != S:
                x2 = jnp.pad(x2, ((0, 0), (0, S_pad - S)))
            cols.append(S_pad)
        else:
            needs_resize.append(True)
            rh = _bilinear_matrix(H, Hk)            # (H, Hk), host f32
            rw = _bilinear_matrix(W, Wk)            # (W, Wk), host f32
            # R^T[(hk,wk),(h,w)] = rh[h,hk] * rw[w,wk]  (built host-side).
            rT_np = np.einsum("hk,wl->klhw", rh, rw).reshape(sk, S)
            if S_pad != S:
                rT_np = np.pad(rT_np, ((0, 0), (0, S_pad - S)))
            rT = ws[k] * jnp.asarray(rT_np)         # fold fusion weight (f32)
            # Feed the MXU in the input's dtype: bf16/f16 inputs get a
            # narrow R^T (native MXU path on v6e/v7x, no pre-matmul casts).
            if x.dtype in (jnp.bfloat16, jnp.float16):
                rT = rT.astype(x.dtype)
            rmats.append(rT)
            cols.append(sk)
        xs2d.append(x2)

    # --- tile-size selection against a generation-aware VMEM budget -------
    budget, vmem_limit = _vmem_budget()
    per_row_in_bytes = sum(
        cols[k] * xs2d[k].dtype.itemsize for k in range(n_features))
    out_row_bytes = S_pad * np.dtype(out_dtype).itemsize
    rt_bytes = sum(int(np.prod(r.shape)) * r.dtype.itemsize
                   for r in rmats if r is not None)
    tc = _pick_tc(NC, per_row_in_bytes, out_row_bytes, rt_bytes, budget)

    NC_pad = _round_up(NC, tc)
    if NC_pad != NC:
        xs2d = [jnp.pad(x2, ((0, NC_pad - NC), (0, 0))) for x2 in xs2d]
    grid = (NC_pad // tc,)

    operands = [ws]                                 # scalar-prefetch arg (SMEM)
    for k in range(n_features):
        operands.append(xs2d[k])
        if needs_resize[k]:
            operands.append(rmats[k])

    kernel = _make_fusion_kernel(n_features, tuple(needs_resize))

    def build_in_specs(single_buffer_rt):
        specs = []
        for k in range(n_features):
            specs.append(pl.BlockSpec((tc, cols[k]), lambda i, w: (i, 0)))
            if needs_resize[k]:
                sk = int(rmats[k].shape[0])
                if single_buffer_rt:
                    # R^T never changes across the grid -> single buffer it
                    # (frees sum(sk*S) bytes of VMEM for a larger TC).
                    specs.append(pl.BlockSpec((sk, S_pad), lambda i, w: (0, 0),
                                              pipeline_mode=pl.Buffered(1)))
                else:
                    specs.append(pl.BlockSpec((sk, S_pad), lambda i, w: (0, 0)))
        return specs

    def run(single_buffer_rt):
        return pl.pallas_call(
            kernel,
            out_shape=jax.ShapeDtypeStruct((NC_pad, S_pad), out_dtype),
            grid_spec=pltpu.PrefetchScalarGridSpec(
                num_scalar_prefetch=1,
                grid=grid,
                in_specs=build_in_specs(single_buffer_rt),
                out_specs=pl.BlockSpec((tc, S_pad), lambda i, w: (i, 0)),
            ),
            compiler_params=pltpu.CompilerParams(
                dimension_semantics=("parallel",),
                vmem_limit_bytes=vmem_limit,
            ),
        )(*operands)

    try:
        out = run(True)
    except Exception:
        # pl.Buffered(1) / pipeline_mode unsupported on this version:
        # fall back to default double-buffering (correctness identical).
        out = run(False)

    out = out[:NC, :S]
    return out.reshape(N, C, H, W)


def _reference(inputs, weight, method="softmax"):
    """Independent host-side float64 reference."""
    xs = [np.asarray(x, dtype=np.float64) for x in inputs]
    w = np.asarray(weight, dtype=np.float64)
    if method == "softmax":
        e = np.exp(w - w.max())
        ws = e / e.sum()
    elif method == "fast-normalize":
        ws = np.maximum(w, 0.0)
        ws = ws / (ws.sum() + 0.0001)
    else:
        ws = np.ones((len(xs),), np.float64)
    N, C, H, W = xs[0].shape
    acc = np.zeros((N, C, H, W), np.float64)
    for wk, x in zip(ws, xs):
        Hk, Wk = x.shape[2:]
        rh = np.asarray(_bilinear_matrix(H, Hk), np.float64)
        rw = np.asarray(_bilinear_matrix(W, Wk), np.float64)
        acc += wk * np.einsum("hk,nckl,wl->nchw", rh, x, rw)
    return acc


if __name__ == "__main__":
    key = jax.random.PRNGKey(0)
    k0, k1, k2 = jax.random.split(key, 3)

    n_features = 2
    # First feature defines the output size; second is smaller -> upsampled.
    x0 = jax.random.normal(k0, (2, 4, 16, 16), dtype=jnp.float32)
    x1 = jax.random.normal(k1, (2, 4, 8, 8), dtype=jnp.float32)

    # Deterministic parameter init mirroring torch.rand(n).softmax(-1)
    weight = jax.nn.softmax(
        jax.random.uniform(k2, (n_features,), dtype=jnp.float32), axis=0)

    out = feature_fusion([x0, x1], weight, method="softmax")
    out = jax.block_until_ready(out)

    ref = _reference([np.asarray(x0), np.asarray(x1)], np.asarray(weight),
                     method="softmax")
    assert out.shape == (2, 4, 16, 16)
    # Tolerance covers MXU f32 multi-pass rounding; structural bugs are O(0.1).
    err = float(np.max(np.abs(np.asarray(out, dtype=np.float64) - ref)))
    assert err < 1e-3, err

    print("KERNEL_OK")
</pallas_src>

<mosaic_0001>
module attributes {stable_mosaic.version = 11 : i64} {
  func.func @kernel(%arg0: i32, %arg1: memref<2xf32, #tpu.memory_space<smem>>, %arg2: memref<8x256xf32, #tpu.memory_space<vmem>>, %arg3: memref<8x64xf32, #tpu.memory_space<vmem>>, %arg4: memref<64x256xf32, #tpu.memory_space<vmem>>, %arg5: memref<8x256xf32, #tpu.memory_space<vmem>>) attributes {dimension_semantics = [#tpu.dimension_semantics<parallel>], iteration_bounds = array<i64: 1>, scalar_prefetch = 1 : i64, scratch_operands = 0 : i64, tpu.core_type = #tpu.core_type<tc>, window_params = [{transform_indices = @transform_0, window_bounds = array<i64: 8, 256>}, {transform_indices = @transform_1, window_bounds = array<i64: 8, 64>}, {pipeline_mode = #tpu.pipeline_mode<synchronous>, transform_indices = @transform_2, window_bounds = array<i64: 64, 256>}, {transform_indices = @transform_3, window_bounds = array<i64: 8, 256>}]} {
    %c0 = arith.constant 0 : index
    %c0_0 = arith.constant 0 : index
    %0 = vector.load %arg2[%c0, %c0_0] : memref<8x256xf32, #tpu.memory_space<vmem>>, vector<8x256xf32>
    %c0_1 = arith.constant 0 : index
    %1 = memref.load %arg1[%c0_1] : memref<2xf32, #tpu.memory_space<smem>>
    %2 = vector.broadcast %1 : f32 to vector<8x256xf32>
    %3 = arith.mulf %2, %0 : vector<8x256xf32>
    %c0_2 = arith.constant 0 : index
    %c0_3 = arith.constant 0 : index
    %4 = vector.load %arg3[%c0_2, %c0_3] : memref<8x64xf32, #tpu.memory_space<vmem>>, vector<8x64xf32>
    %c0_4 = arith.constant 0 : index
    %c0_5 = arith.constant 0 : index
    %5 = vector.load %arg4[%c0_4, %c0_5] : memref<64x256xf32, #tpu.memory_space<vmem>>, vector<64x256xf32>
    %cst = arith.constant dense<0.000000e+00> : vector<8x256xf32>
    %6 = tpu.matmul %4, %5, %cst {dimension_numbers = #tpu.dot_dimension_numbers<[1], [0], [0], [1], [0, 0, 1, 1], [], []>} : vector<8x64xf32>, vector<64x256xf32>, vector<8x256xf32> -> vector<8x256xf32>
    %7 = arith.addf %3, %6 : vector<8x256xf32>
    %c0_6 = arith.constant 0 : index
    %c0_7 = arith.constant 0 : index
    %8 = vector.load %arg5[%c0_6, %c0_7] : memref<8x256xf32, #tpu.memory_space<vmem>>, vector<8x256xf32>
    tpu.vector_store %arg5[%c0_6, %c0_7], %7 {strides = array<i32>} : memref<8x256xf32, #tpu.memory_space<vmem>>, vector<8x256xf32>,
    return
  }
  func.func @transform_0(%arg0: i32, %arg1: memref<2xf32, #tpu.memory_space<smem>>) -> (i32, i32) {
    %c0_i32 = arith.constant 0 : i32
    %c0_i32_0 = arith.constant 0 : i32
    return %arg0, %c0_i32 : i32, i32
  }
  func.func @transform_1(%arg0: i32, %arg1: memref<2xf32, #tpu.memory_space<smem>>) -> (i32, i32) {
    %c0_i32 = arith.constant 0 : i32
    %c0_i32_0 = arith.constant 0 : i32
    return %arg0, %c0_i32 : i32, i32
  }
  func.func @transform_2(%arg0: i32, %arg1: memref<2xf32, #tpu.memory_space<smem>>) -> (i32, i32) {
    %c0_i32 = arith.constant 0 : i32
    %c0_i32_0 = arith.constant 0 : i32
    %c0_i32_1 = arith.constant 0 : i32
    return %c0_i32, %c0_i32_0 : i32, i32
  }
  func.func @transform_3(%arg0: i32, %arg1: memref<2xf32, #tpu.memory_space<smem>>) -> (i32, i32) {
    %c0_i32 = arith.constant 0 : i32
    %c0_i32_0 = arith.constant 0 : i32
    return %arg0, %c0_i32 : i32, i32
  }
}

module attributes {stable_mosaic.version = 11 : i64} {
  func.func @kernel(%arg0: i32, %arg1: memref<2xf32, #tpu.memory_space<smem>>, %arg2: memref<8x256xf32, #tpu.memory_space<vmem>>, %arg3: memref<8x64xf32, #tpu.memory_space<vmem>>, %arg4: memref<64x256xf32, #tpu.memory_space<vmem>>, %arg5: memref<8x256xf32, #tpu.memory_space<vmem>>) attributes {dimension_semantics = [#tpu.dimension_semantics<parallel>], iteration_bounds = array<i64: 1>, scalar_prefetch = 1 : i64, scratch_operands = 0 : i64, tpu.core_type = #tpu.core_type<tc>, window_params = [{transform_indices = @transform_0, window_bounds = array<i64: 8, 256>}, {transform_indices = @transform_1, window_bounds = array<i64: 8, 64>}, {pipeline_mode = #tpu.pipeline_mode<synchronous>, transform_indices = @transform_2, window_bounds = array<i64: 64, 256>}, {transform_indices = @transform_3, window_bounds = array<i64: 8, 256>}]} {
    %c0 = arith.constant 0 : index
    %c0_0 = arith.constant 0 : index
    %0 = vector.load %arg2[%c0, %c0_0] : memref<8x256xf32, #tpu.memory_space<vmem>>, vector<8x256xf32>
    %c0_1 = arith.constant 0 : index
    %1 = memref.load %arg1[%c0_1] : memref<2xf32, #tpu.memory_space<smem>>
    %2 = vector.broadcast %1 : f32 to vector<8x256xf32>
    %3 = arith.mulf %2, %0 : vector<8x256xf32>
    %c0_2 = arith.constant 0 : index
    %c0_3 = arith.constant 0 : index
    %4 = vector.load %arg3[%c0_2, %c0_3] : memref<8x64xf32, #tpu.memory_space<vmem>>, vector<8x64xf32>
    %c0_4 = arith.constant 0 : index
    %c0_5 = arith.constant 0 : index
    %5 = vector.load %arg4[%c0_4, %c0_5] : memref<64x256xf32, #tpu.memory_space<vmem>>, vector<64x256xf32>
    %cst = arith.constant dense<0.000000e+00> : vector<8x256xf32>
    %6 = tpu.matmul %4, %5, %cst {dimension_numbers = #tpu.dot_dimension_numbers<[1], [0], [0], [1], [0, 0, 1, 1], [], []>} : vector<8x64xf32>, vector<64x256xf32>, vector<8x256xf32> -> vector<8x256xf32>
    %7 = arith.addf %3, %6 : vector<8x256xf32>
    %c0_6 = arith.constant 0 : index
    %c0_7 = arith.constant 0 : index
    %8 = vector.load %arg5[%c0_6, %c0_7] : memref<8x256xf32, #tpu.memory_space<vmem>>, vector<8x256xf32>
    tpu.vector_store %arg5[%c0_6, %c0_7], %7 {strides = array<i32>} : memref<8x256xf32, #tpu.memory_space<vmem>>, vector<8x256xf32>,
    return
  }
  func.func @transform_0(%arg0: i32, %arg1: memref<2xf32, #tpu.memory_space<smem>>) -> (i32, i32) {
    %c0_i32 = arith.constant 0 : i32
    %c0_i32_0 = arith.constant 0 : i32
    return %arg0, %c0_i32 : i32, i32
  }
  func.func @transform_1(%arg0: i32, %arg1: memref<2xf32, #tpu.memory_space<smem>>) -> (i32, i32) {
    %c0_i32 = arith.constant 0 : i32
    %c0_i32_0 = arith.constant 0 : i32
    return %arg0, %c0_i32 : i32, i32
  }
  func.func @transform_2(%arg0: i32, %arg1: memref<2xf32, #tpu.memory_space<smem>>) -> (i32, i32) {
    %c0_i32 = arith.constant 0 : i32
    %c0_i32_0 = arith.constant 0 : i32
    %c0_i32_1 = arith.constant 0 : i32
    return %c0_i32, %c0_i32_0 : i32, i32
  }
  func.func @transform_3(%arg0: i32, %arg1: memref<2xf32, #tpu.memory_space<smem>>) -> (i32, i32) {
    %c0_i32 = arith.constant 0 : i32
    %c0_i32_0 = arith.constant 0 : i32
    return %arg0, %c0_i32 : i32, i32
  }
}

</mosaic_0001>

<bundles_post_ra>
// kernel: tpu_custom_call.1
= control target key start
LH: loop header
LB: loop body
LE: loop exit
PB: predicated region body
PF: predicated region fallthrough
CT: control target
= control target key end

     0   :  { %s281_s18 = smov [#allocation3]   ;;  %s328_s0 = inlined_call_operand.hbm [shape: f32[2], index: 0, kind: input, shape index: {}]   ;;  %s329_s1 = inlined_call_operand.hbm [shape: f32[8,256], index: 1, kind: input, shape index: {}]   ;;  %s330_s2 = inlined_call_operand.hbm [shape: f32[8,64], index: 2, kind: input, shape index: {}]   ;;  %s331_s3 = inlined_call_operand.hbm [shape: f32[64,256], index: 3, kind: input, shape index: {}]   ;;  %s332_s4 = inlined_call_operand.hbm [shape: f32[8,256], index: 4, kind: output, shape index: {}]  }
   0x1   :  { %s10_s17 = sshll.u32 %s328_s0, 4  ;;  %s11_s17 = int_to_ptr.hbm [resolvable:$true] %s10_s17 }
   0x2   :  { %13 = dma.hbm_to_smem %s11_s17, 16, %s281_s18, [#allocation2] }
   0x3   :  { %273 = dma.done.wait [#allocation2], 16 }
   0x4   :  { %274 = vsyncadd [#allocation2], 4294967280 }
   0x5   :  { %16 = sfence }
   0x6   :  { %17 = vsyncpa [#allocation5], 0 }
   0x7   :  { %18 = vsyncpa [#allocation8], 0  ;;  %s36_s21 = sshll.u32 %s330_s2, 4  ;;  %s37_s21 = int_to_ptr.hbm [resolvable:$true] %s36_s21 }
   0x8   :  { %19 = vsyncpa [#allocation6], 0  ;;  %s282_s22 = smov [#allocation7]   ;;  %s25_s0 = sshll.u32 %s329_s1, 4  ;;  %s26_s0 = int_to_ptr.hbm [resolvable:$true] %s25_s0 }
   0x9   :  { %s38_s23 = sshll.u32 %s282_s22, 4  ;;  %s283_s26 = smov [#allocation4]   ;;  %s39_s23 = int_to_ptr.vmem [resolvable:$true] %s38_s23 }
   0xa   :  { %41 = dma.hbm_to_vmem [thread:$0]  %s37_s21, 128, %s39_s23, [#allocation8]  }
   0xb   :  { %s27_s27 = sshll.u32 %s283_s26, 4  ;;  %s46_s30 = sshll.u32 %s331_s3, 4  ;;  %s28_s27 = int_to_ptr.vmem [resolvable:$true] %s27_s27  ;;  %s47_s30 = int_to_ptr.hbm [resolvable:$true] %s46_s30 }
   0xc   :  { %30 = dma.hbm_to_vmem [thread:$0]  %s26_s0, 256, %s28_s27, [#allocation5]  }
   0xd   :  { %s284_s2 = smov [#allocation9]   ;;  %s285_s6 = smov 256  }
   0xe   :  { %s48_s5 = sshll.u32 %s284_s2, 4  ;;  %s286_s7 = smov 16   ;;  %s49_s5 = int_to_ptr.vmem [resolvable:$true] %s48_s5 }
   0xf   :  { %54 = dma.hbm_to_vmem [thread:$0]  %s47_s30, 2048, %s49_s5, [#allocation8], %s285_s6, %s285_s6, %s286_s7  }
  0x10   :  { %275 = dma.done.wait [#allocation5], 256  }
  0x11   :  { %276 = vsyncadd [#allocation5], 4294967040 }
  0x12   :  { %277 = dma.done.wait [#allocation8], 2176  }
  0x13   :  { %278 = vsyncadd [#allocation8], 4294965120  ;;  %v88_v0 = vld [vmem:[#allocation9 + $0x70] sm:$0xff]  ;;  %v89_v1 = vld [vmem:[#allocation9 + $0x78] sm:$0xff]  ;;  %vm90_vm0 = vcmask 523264   ;;  %s69_s1 = sld [smem:[#allocation3]] }
  0x14   :  { %v86_v2 = vld [vmem:[#allocation9 + $0x60] sm:$0xff]  ;;  %102 = vmatpush.msra.mxu0 %v88_v0  ;;  %122 = vmatpush.msra.mxu1 %v89_v1  ;;  %v87_v3 = vld [vmem:[#allocation9 + $0x68] sm:$0xff]  ;;  %v84_v4 = vld [vmem:[#allocation9 + $0x50] sm:$0xff]  ;;  %s287_s3 = smov [#allocation10]   ;;  %s145_s11 = sshll.u32 %s332_s4, 4  ;;  %s146_s11 = int_to_ptr.hbm [resolvable:$true] %s145_s11 }
  0x15   :  { %v85_v5 = vld [vmem:[#allocation9 + $0x58] sm:$0xff]  ;;  %v82_v6 = vld [vmem:[#allocation9 + $0x40] sm:$0xff]  ;;  %v83_v7 = vld [vmem:[#allocation9 + $0x48] sm:$0xff]  ;;  %s143_s8 = sshll.u32 %s287_s3, 4  ;;  %s144_s8 = int_to_ptr.vmem [resolvable:$true] %s143_s8 }
  0x16   :  { %103 = vmatpush.msra.mxu0 %v86_v2  ;;  %123 = vmatpush.msra.mxu1 %v87_v3  ;;  %v80_v8 = vld [vmem:[#allocation9 + $0x30] sm:$0xff]  ;;  %v81_v9 = vld [vmem:[#allocation9 + $0x38] sm:$0xff]  ;;  %v78_v10 = vld [vmem:[#allocation9 + $0x20] sm:$0xff] }
  0x17   :  { %v79_v11 = vld [vmem:[#allocation9 + $0x28] sm:$0xff]  ;;  %v76_v12 = vld [vmem:[#allocation9 + $0x10] sm:$0xff]  ;;  %v77_v13 = vld [vmem:[#allocation9 + $0x18] sm:$0xff] }
  0x18   :  { %104 = vmatpush.msra.mxu0 %v84_v4  ;;  %124 = vmatpush.msra.mxu1 %v85_v5  ;;  %v74_v14 = vld [vmem:[#allocation9] sm:$0xff]  ;;  %v75_v15 = vld [vmem:[#allocation9 + $0x8] sm:$0xff]  ;;  %v73_v16 = vld [vmem:[#allocation7] sm:$0xff] }
  0x19   :  { %v67_v17 = vld [vmem:[#allocation4] sm:$0xff]  ;;  %v70_v18 = vstv %s69_s1  ;;  %v68_v19 = vld [vmem:[#allocation4 + $0x8] sm:$0xff] }
  0x1a   :  { %105 = vmatpush.msra.mxu0 %v82_v6  ;;  %125 = vmatpush.msra.mxu1 %v83_v7  ;;  %v71_v20 = vmul.f32 %v70_v18, %v67_v17  ;;  %v72_v21 = vmul.f32 %v70_v18, %v68_v19 }
  0x1c   :  { %106 = vmatpush.msra.mxu0 %v80_v8  ;;  %126 = vmatpush.msra.mxu1 %v81_v9 }
  0x1e   :  { %107 = vmatpush.msra.mxu0 %v78_v10  ;;  %127 = vmatpush.msra.mxu1 %v79_v11 }
  0x20   :  { %108 = vmatpush.msra.mxu0 %v76_v12  ;;  %128 = vmatpush.msra.mxu1 %v77_v13 }
  0x22   :  { %109 = vmatpush.msra.mxu0 %v74_v14  ;;  %129 = vmatpush.msra.mxu1 %v75_v15 }
  0x23   :  { %156 = vmatmul.msk.f32.vlgmr.msra.gmra.mxu0 %vm90_vm0, %v73_v16  ;;  %157 = vmatmul.msk.f32.vlgmr.msra.gmra.mxu1 %vm90_vm0, %v73_v16 }
  0xa0   :  { %v111_v22 = vpop.f32.mrf.mxu0  ;;  %v131_v23 = vpop.f32.mrf.mxu1 }
  0xa1   :  { %v134_v24 = vadd.f32 %v111_v22, %v71_v20  ;;  %v135_v25 = vadd.f32 %v131_v23, %v72_v21 }
  0xa3   :  { %136 = vst [vmem:[#allocation10] sm:$0xff] %v134_v24 }
  0xa4   :  { %137 = vst [vmem:[#allocation10 + $0x8] sm:$0xff] %v135_v25 }
  0xa5   :  { %148 = dma.vmem_to_hbm [thread:$0]  %s144_s8, 256, %s146_s11, [#allocation6]  }
  0xa6   :  { %279 = dma.done.wait [#allocation6], 256  }
  0xa7   :  { %280 = vsyncadd [#allocation6], 4294967040 }
  0xa8   :  { %153 = vsyncpa [#allocation5], 1 }
  0xa9   :  { %154 = vsyncpa [#allocation8], 1 }
  0xaa   :  { %155 = vsyncpa [#allocation6], 1 }

// kernel: tpu_custom_call.1
= control target key start
LH: loop header
LB: loop body
LE: loop exit
PB: predicated region body
PF: predicated region fallthrough
CT: control target
= control target key end

     0   :  { %s281_s18 = smov [#allocation3]   ;;  %s328_s0 = inlined_call_operand.hbm [shape: f32[2], index: 0, kind: input, shape index: {}]   ;;  %s329_s1 = inlined_call_operand.hbm [shape: f32[8,256], index: 1, kind: input, shape index: {}]   ;;  %s330_s2 = inlined_call_operand.hbm [shape: f32[8,64], index: 2, kind: input, shape index: {}]   ;;  %s331_s3 = inlined_call_operand.hbm [shape: f32[64,256], index: 3, kind: input, shape index: {}]   ;;  %s332_s4 = inlined_call_operand.hbm [shape: f32[8,256], index: 4, kind: output, shape index: {}]  }
   0x1   :  { %s10_s17 = sshll.u32 %s328_s0, 4  ;;  %s11_s17 = int_to_ptr.hbm [resolvable:$true] %s10_s17 }
   0x2   :  { %13 = dma.hbm_to_smem %s11_s17, 16, %s281_s18, [#allocation2] }
   0x3   :  { %273 = dma.done.wait [#allocation2], 16 }
   0x4   :  { %274 = vsyncadd [#allocation2], 4294967280 }
   0x5   :  { %16 = sfence }
   0x6   :  { %17 = vsyncpa [#allocation5], 0 }
   0x7   :  { %18 = vsyncpa [#allocation8], 0  ;;  %s36_s21 = sshll.u32 %s330_s2, 4  ;;  %s37_s21 = int_to_ptr.hbm [resolvable:$true] %s36_s21 }
   0x8   :  { %19 = vsyncpa [#allocation6], 0  ;;  %s282_s22 = smov [#allocation7]   ;;  %s25_s0 = sshll.u32 %s329_s1, 4  ;;  %s26_s0 = int_to_ptr.hbm [resolvable:$true] %s25_s0 }
   0x9   :  { %s38_s23 = sshll.u32 %s282_s22, 4  ;;  %s283_s26 = smov [#allocation4]   ;;  %s39_s23 = int_to_ptr.vmem [resolvable:$true] %s38_s23 }
   0xa   :  { %41 = dma.hbm_to_vmem [thread:$0]  %s37_s21, 128, %s39_s23, [#allocation8]  }
   0xb   :  { %s27_s27 = sshll.u32 %s283_s26, 4  ;;  %s46_s30 = sshll.u32 %s331_s3, 4  ;;  %s28_s27 = int_to_ptr.vmem [resolvable:$true] %s27_s27  ;;  %s47_s30 = int_to_ptr.hbm [resolvable:$true] %s46_s30 }
   0xc   :  { %30 = dma.hbm_to_vmem [thread:$0]  %s26_s0, 256, %s28_s27, [#allocation5]  }
   0xd   :  { %s284_s2 = smov [#allocation9]   ;;  %s285_s6 = smov 256  }
   0xe   :  { %s48_s5 = sshll.u32 %s284_s2, 4  ;;  %s286_s7 = smov 16   ;;  %s49_s5 = int_to_ptr.vmem [resolvable:$true] %s48_s5 }
   0xf   :  { %54 = dma.hbm_to_vmem [thread:$0]  %s47_s30, 2048, %s49_s5, [#allocation8], %s285_s6, %s285_s6, %s286_s7  }
  0x10   :  { %275 = dma.done.wait [#allocation5], 256  }
  0x11   :  { %276 = vsyncadd [#allocation5], 4294967040 }
  0x12   :  { %277 = dma.done.wait [#allocation8], 2176  }
  0x13   :  { %278 = vsyncadd [#allocation8], 4294965120  ;;  %v88_v0 = vld [vmem:[#allocation9 + $0x70] sm:$0xff]  ;;  %v89_v1 = vld [vmem:[#allocation9 + $0x78] sm:$0xff]  ;;  %vm90_vm0 = vcmask 523264   ;;  %s69_s1 = sld [smem:[#allocation3]] }
  0x14   :  { %v86_v2 = vld [vmem:[#allocation9 + $0x60] sm:$0xff]  ;;  %102 = vmatpush.msra.mxu0 %v88_v0  ;;  %122 = vmatpush.msra.mxu1 %v89_v1  ;;  %v87_v3 = vld [vmem:[#allocation9 + $0x68] sm:$0xff]  ;;  %v84_v4 = vld [vmem:[#allocation9 + $0x50] sm:$0xff]  ;;  %s287_s3 = smov [#allocation10]   ;;  %s145_s11 = sshll.u32 %s332_s4, 4  ;;  %s146_s11 = int_to_ptr.hbm [resolvable:$true] %s145_s11 }
  0x15   :  { %v85_v5 = vld [vmem:[#allocation9 + $0x58] sm:$0xff]  ;;  %v82_v6 = vld [vmem:[#allocation9 + $0x40] sm:$0xff]  ;;  %v83_v7 = vld [vmem:[#allocation9 + $0x48] sm:$0xff]  ;;  %s143_s8 = sshll.u32 %s287_s3, 4  ;;  %s144_s8 = int_to_ptr.vmem [resolvable:$true] %s143_s8 }
  0x16   :  { %103 = vmatpush.msra.mxu0 %v86_v2  ;;  %123 = vmatpush.msra.mxu1 %v87_v3  ;;  %v80_v8 = vld [vmem:[#allocation9 + $0x30] sm:$0xff]  ;;  %v81_v9 = vld [vmem:[#allocation9 + $0x38] sm:$0xff]  ;;  %v78_v10 = vld [vmem:[#allocation9 + $0x20] sm:$0xff] }
  0x17   :  { %v79_v11 = vld [vmem:[#allocation9 + $0x28] sm:$0xff]  ;;  %v76_v12 = vld [vmem:[#allocation9 + $0x10] sm:$0xff]  ;;  %v77_v13 = vld [vmem:[#allocation9 + $0x18] sm:$0xff] }
  0x18   :  { %104 = vmatpush.msra.mxu0 %v84_v4  ;;  %124 = vmatpush.msra.mxu1 %v85_v5  ;;  %v74_v14 = vld [vmem:[#allocation9] sm:$0xff]  ;;  %v75_v15 = vld [vmem:[#allocation9 + $0x8] sm:$0xff]  ;;  %v73_v16 = vld [vmem:[#allocation7] sm:$0xff] }
  0x19   :  { %v67_v17 = vld [vmem:[#allocation4] sm:$0xff]  ;;  %v70_v18 = vstv %s69_s1  ;;  %v68_v19 = vld [vmem:[#allocation4 + $0x8] sm:$0xff] }
  0x1a   :  { %105 = vmatpush.msra.mxu0 %v82_v6  ;;  %125 = vmatpush.msra.mxu1 %v83_v7  ;;  %v71_v20 = vmul.f32 %v70_v18, %v67_v17  ;;  %v72_v21 = vmul.f32 %v70_v18, %v68_v19 }
  0x1c   :  { %106 = vmatpush.msra.mxu0 %v80_v8  ;;  %126 = vmatpush.msra.mxu1 %v81_v9 }
  0x1e   :  { %107 = vmatpush.msra.mxu0 %v78_v10  ;;  %127 = vmatpush.msra.mxu1 %v79_v11 }
  0x20   :  { %108 = vmatpush.msra.mxu0 %v76_v12  ;;  %128 = vmatpush.msra.mxu1 %v77_v13 }
  0x22   :  { %109 = vmatpush.msra.mxu0 %v74_v14  ;;  %129 = vmatpush.msra.mxu1 %v75_v15 }
  0x23   :  { %156 = vmatmul.msk.f32.vlgmr.msra.gmra.mxu0 %vm90_vm0, %v73_v16  ;;  %157 = vmatmul.msk.f32.vlgmr.msra.gmra.mxu1 %vm90_vm0, %v73_v16 }
  0xa0   :  { %v111_v22 = vpop.f32.mrf.mxu0  ;;  %v131_v23 = vpop.f32.mrf.mxu1 }
  0xa1   :  { %v134_v24 = vadd.f32 %v111_v22, %v71_v20  ;;  %v135_v25 = vadd.f32 %v131_v23, %v72_v21 }
  0xa3   :  { %136 = vst [vmem:[#allocation10] sm:$0xff] %v134_v24 }
  0xa4   :  { %137 = vst [vmem:[#allocation10 + $0x8] sm:$0xff] %v135_v25 }
  0xa5   :  { %148 = dma.vmem_to_hbm [thread:$0]  %s144_s8, 256, %s146_s11, [#allocation6]  }
  0xa6   :  { %279 = dma.done.wait [#allocation6], 256  }
  0xa7   :  { %280 = vsyncadd [#allocation6], 4294967040 }
  0xa8   :  { %153 = vsyncpa [#allocation5], 1 }
  0xa9   :  { %154 = vsyncpa [#allocation8], 1 }
  0xaa   :  { %155 = vsyncpa [#allocation6], 1 }

</bundles_post_ra>
